<compile_context>
chip_gen: v7x
topology: tpu7x:2x2x1
jax: 0.10.0
libtpu: 0.0.40
codegen_flags: <defaults>
</compile_context>

<pallas_src>
import jax
import jax.numpy as jnp
from jax.experimental import pallas as pl
from jax.experimental.pallas import tpu as pltpu


def _control_nn_kernel(x_ref, wcat_ref, bcat_ref, w2t_ref, b2_ref, out_ref):
    """VPU-only fused forward for one batch tile.

    z   = x @ [W1 | Wv] + [b1 | bv]   (F tiny -> unrolled broadcast MACs, no MXU)
    h   = tanh(z[:, :H]) ;  v = relu(z[:, H:])
    pi  = h @ W2 + b2                 (P tiny -> cross-lane reduction, no MXU)
    out = [pi | v]                    (single lane-contiguous output tile)
    """
    x = x_ref[...]                       # [tb, F] f32 (input already f32)
    tb, F = x.shape
    H = w2t_ref.shape[1]
    P = w2t_ref.shape[0]

    # --- fused first stage: unroll the tiny contraction dim F on the VPU ---
    z = bcat_ref[...]                    # [1, H+V], broadcasts through the adds
    for f in range(F):                   # static unroll (F == 2)
        z = z + x[:, f:f + 1] * wcat_ref[f:f + 1, :]

    h = jnp.tanh(z[:, :H])               # policy hidden (EUP tanh)
    v = jnp.maximum(z[:, H:], 0.0)       # value branch ReLU

    # --- policy head: P is tiny, do lane reductions instead of an MXU matmul ---
    cols = [jnp.sum(h * w2t_ref[p:p + 1, :], axis=-1, keepdims=True)
            for p in range(P)]
    pi = cols[0] if P == 1 else jnp.concatenate(cols, axis=-1)
    pi = pi + b2_ref[...]

    # single lane-contiguous output block [tb, P+V]
    out_ref[:, :P] = pi
    out_ref[:, P:] = v


def control_nn_forward(features, params, *, block_b=None):
    """features: [B, F] float32. Returns (latent_pi [B, P], latent_vf [B, V])."""
    B, F = features.shape
    w1, b1, w2, b2, wv, bv = (params["w1"], params["b1"], params["w2"],
                              params["b2"], params["wv"], params["bv"])
    H = w1.shape[1]
    P = w2.shape[1]
    V = wv.shape[1]

    # Pack both first-stage linears into one fused weight/bias (lane concat),
    # pre-shape biases to [1, N], and pre-transpose the policy head to [P, H].
    wcat = jnp.concatenate([w1, wv], axis=1)                    # [F, H+V]
    bcat = jnp.concatenate([b1, bv], axis=0).reshape(1, H + V)  # [1, H+V]
    w2t = jnp.transpose(w2).reshape(P, H)                       # [P, H]
    b2r = b2.reshape(1, P)                                      # [1, P]

    # Tile the batch when it is large (amortize launch / shard across cores);
    # fall back to a single full block otherwise.
    if block_b is None:
        block_b = B if B <= 512 else 512
    if B % block_b != 0 or (block_b != B and block_b % 8 != 0):
        block_b = B
    grid = (B // block_b,)

    def full(a):
        return pl.BlockSpec(a.shape, lambda i: (0,) * a.ndim)

    cost = pl.CostEstimate(
        flops=2 * B * (F * (H + V) + H * P),
        transcendentals=B * H,
        bytes_accessed=4 * (B * F + F * (H + V) + (H + V) + P * H + P
                            + B * (P + V)),
    )

    out = pl.pallas_call(
        _control_nn_kernel,
        out_shape=jax.ShapeDtypeStruct((B, P + V), jnp.float32),
        grid=grid,
        in_specs=[
            pl.BlockSpec((block_b, F), lambda i: (i, 0)),   # x tile over batch
            full(wcat), full(bcat), full(w2t), full(b2r),   # replicated weights
        ],
        out_specs=pl.BlockSpec((block_b, P + V), lambda i: (i, 0)),
        compiler_params=pltpu.CompilerParams(
            dimension_semantics=("parallel",)),
        cost_estimate=cost,
    )(features, wcat, bcat, w2t, b2r)

    return out[:, :P], out[:, P:]


def init_params(key, feature_dim=2, hidden_dim=32,
                last_layer_dim_pi=1, last_layer_dim_vf=1):
    """Deterministic synthetic parameters (no checkpoint load)."""
    k1, k2, k3, k4, k5, k6 = jax.random.split(key, 6)
    scale = 0.1
    return {
        # policy net stand-in: F -> H -> P
        "w1": scale * jax.random.normal(k1, (feature_dim, hidden_dim), jnp.float32),
        "b1": scale * jax.random.normal(k2, (hidden_dim,), jnp.float32),
        "w2": scale * jax.random.normal(k3, (hidden_dim, last_layer_dim_pi), jnp.float32),
        "b2": scale * jax.random.normal(k4, (last_layer_dim_pi,), jnp.float32),
        # value net: F -> V (Linear + ReLU)
        "wv": scale * jax.random.normal(k5, (feature_dim, last_layer_dim_vf), jnp.float32),
        "bv": scale * jax.random.normal(k6, (last_layer_dim_vf,), jnp.float32),
    }


if __name__ == "__main__":
    batch = 8
    feature_dim = 2
    hidden_dim = 32
    last_layer_dim_pi = 1
    last_layer_dim_vf = 1

    key = jax.random.PRNGKey(0)
    pkey, xkey = jax.random.split(key)
    params = init_params(pkey, feature_dim, hidden_dim,
                         last_layer_dim_pi, last_layer_dim_vf)
    features = jax.random.normal(xkey, (batch, feature_dim), jnp.float32)

    fwd = jax.jit(control_nn_forward)
    latent_pi, latent_vf = fwd(features, params)
    jax.block_until_ready((latent_pi, latent_vf))

    # Pure-JAX reference check (same math outside Pallas).
    h_ref = jnp.tanh(features @ params["w1"] + params["b1"])
    pi_ref = h_ref @ params["w2"] + params["b2"]
    vf_ref = jnp.maximum(features @ params["wv"] + params["bv"], 0.0)
    assert latent_pi.shape == (batch, last_layer_dim_pi)
    assert latent_vf.shape == (batch, last_layer_dim_vf)
    assert jnp.allclose(latent_pi, pi_ref, atol=1e-5), "policy branch mismatch"
    assert jnp.allclose(latent_vf, vf_ref, atol=1e-5), "value branch mismatch"

    print("KERNEL_OK")
</pallas_src>

<mosaic_0001>
module attributes {stable_mosaic.version = 11 : i64} {
  func.func @_control_nn_kernel(%arg0: i32, %arg1: memref<8x2xf32, #tpu.memory_space<vmem>>, %arg2: memref<2x33xf32, #tpu.memory_space<vmem>>, %arg3: memref<1x33xf32, #tpu.memory_space<vmem>>, %arg4: memref<1x32xf32, #tpu.memory_space<vmem>>, %arg5: memref<1x1xf32, #tpu.memory_space<vmem>>, %arg6: memref<8x2xf32, #tpu.memory_space<vmem>>) attributes {dimension_semantics = [#tpu.dimension_semantics<parallel>], iteration_bounds = array<i64: 1>, scalar_prefetch = 0 : i64, scratch_operands = 0 : i64, tpu.core_type = #tpu.core_type<tc>, window_params = [{transform_indices = @transform_0, window_bounds = array<i64: 8, 2>}, {pipeline_mode = #tpu.pipeline_mode<synchronous>, transform_indices = @transform_1, window_bounds = array<i64: 2, 33>}, {pipeline_mode = #tpu.pipeline_mode<synchronous>, transform_indices = @transform_2, window_bounds = array<i64: 1, 33>}, {pipeline_mode = #tpu.pipeline_mode<synchronous>, transform_indices = @transform_3, window_bounds = array<i64: 1, 32>}, {pipeline_mode = #tpu.pipeline_mode<synchronous>, transform_indices = @transform_4, window_bounds = array<i64: 1, 1>}, {transform_indices = @transform_5, window_bounds = array<i64: 8, 2>}]} {
    %c0 = arith.constant 0 : index
    %c0_0 = arith.constant 0 : index
    %0 = vector.load %arg1[%c0, %c0_0] : memref<8x2xf32, #tpu.memory_space<vmem>>, vector<8x2xf32>
    %c0_1 = arith.constant 0 : index
    %c0_2 = arith.constant 0 : index
    %1 = vector.load %arg3[%c0_1, %c0_2] : memref<1x33xf32, #tpu.memory_space<vmem>>, vector<1x33xf32>
    %2 = vector.extract_strided_slice %0 {offsets = [0, 0], sizes = [8, 1], strides = [1, 1]} : vector<8x2xf32> to vector<8x1xf32>
    %c0_3 = arith.constant 0 : index
    %c0_4 = arith.constant 0 : index
    %3 = vector.load %arg2[%c0_3, %c0_4] : memref<2x33xf32, #tpu.memory_space<vmem>>, vector<1x33xf32>
    %4 = vector.broadcast %2 : vector<8x1xf32> to vector<8x33xf32>
    %5 = vector.broadcast %3 : vector<1x33xf32> to vector<8x33xf32>
    %6 = arith.mulf %4, %5 : vector<8x33xf32>
    %7 = vector.broadcast %1 : vector<1x33xf32> to vector<8x33xf32>
    %8 = arith.addf %7, %6 : vector<8x33xf32>
    %9 = vector.extract_strided_slice %0 {offsets = [0, 1], sizes = [8, 1], strides = [1, 1]} : vector<8x2xf32> to vector<8x1xf32>
    %c1 = arith.constant 1 : index
    %c0_5 = arith.constant 0 : index
    %10 = vector.load %arg2[%c1, %c0_5] : memref<2x33xf32, #tpu.memory_space<vmem>>, vector<1x33xf32>
    %11 = vector.broadcast %9 : vector<8x1xf32> to vector<8x33xf32>
    %12 = vector.broadcast %10 : vector<1x33xf32> to vector<8x33xf32>
    %13 = arith.mulf %11, %12 : vector<8x33xf32>
    %14 = arith.addf %8, %13 : vector<8x33xf32>
    %15 = vector.extract_strided_slice %14 {offsets = [0, 0], sizes = [8, 32], strides = [1, 1]} : vector<8x33xf32> to vector<8x32xf32>
    %16 = math.tanh %15 : vector<8x32xf32>
    %17 = vector.extract_strided_slice %14 {offsets = [0, 32], sizes = [8, 1], strides = [1, 1]} : vector<8x33xf32> to vector<8x1xf32>
    %cst = arith.constant 0.000000e+00 : f32
    %18 = vector.broadcast %cst : f32 to vector<8x1xf32>
    %19 = arith.maximumf %17, %18 : vector<8x1xf32>
    %c0_6 = arith.constant 0 : index
    %c0_7 = arith.constant 0 : index
    %20 = vector.load %arg4[%c0_6, %c0_7] : memref<1x32xf32, #tpu.memory_space<vmem>>, vector<1x32xf32>
    %21 = vector.broadcast %20 : vector<1x32xf32> to vector<8x32xf32>
    %22 = arith.mulf %16, %21 : vector<8x32xf32>
    %cst_8 = arith.constant dense<0.000000e+00> : vector<8xf32>
    %23 = vector.multi_reduction <add>, %22, %cst_8 [1] : vector<8x32xf32> to vector<8xf32>
    %24 = vector.shape_cast %23 : vector<8xf32> to vector<8x1xf32>
    %c0_9 = arith.constant 0 : index
    %c0_10 = arith.constant 0 : index
    %25 = vector.load %arg5[%c0_9, %c0_10] : memref<1x1xf32, #tpu.memory_space<vmem>>, vector<1x1xf32>
    %26 = vector.broadcast %25 : vector<1x1xf32> to vector<8x1xf32>
    %27 = arith.addf %24, %26 : vector<8x1xf32>
    %c0_11 = arith.constant 0 : index
    %c0_12 = arith.constant 0 : index
    %28 = vector.load %arg6[%c0_11, %c0_12] : memref<8x2xf32, #tpu.memory_space<vmem>>, vector<8x1xf32>
    tpu.vector_store %arg6[%c0_11, %c0_12], %27 {strides = array<i32>} : memref<8x2xf32, #tpu.memory_space<vmem>>, vector<8x1xf32>,
    %c0_13 = arith.constant 0 : index
    %c1_14 = arith.constant 1 : index
    %29 = vector.load %arg6[%c0_13, %c1_14] : memref<8x2xf32, #tpu.memory_space<vmem>>, vector<8x1xf32>
    tpu.vector_store %arg6[%c0_13, %c1_14], %19 {strides = array<i32>} : memref<8x2xf32, #tpu.memory_space<vmem>>, vector<8x1xf32>,
    return
  }
  func.func @transform_0(%arg0: i32) -> (i32, i32) {
    %c0_i32 = arith.constant 0 : i32
    %c0_i32_0 = arith.constant 0 : i32
    return %arg0, %c0_i32 : i32, i32
  }
  func.func @transform_1(%arg0: i32) -> (i32, i32) {
    %c0_i32 = arith.constant 0 : i32
    %c0_i32_0 = arith.constant 0 : i32
    %c0_i32_1 = arith.constant 0 : i32
    return %c0_i32, %c0_i32_0 : i32, i32
  }
  func.func @transform_2(%arg0: i32) -> (i32, i32) {
    %c0_i32 = arith.constant 0 : i32
    %c0_i32_0 = arith.constant 0 : i32
    %c0_i32_1 = arith.constant 0 : i32
    return %c0_i32, %c0_i32_0 : i32, i32
  }
  func.func @transform_3(%arg0: i32) -> (i32, i32) {
    %c0_i32 = arith.constant 0 : i32
    %c0_i32_0 = arith.constant 0 : i32
    %c0_i32_1 = arith.constant 0 : i32
    return %c0_i32, %c0_i32_0 : i32, i32
  }
  func.func @transform_4(%arg0: i32) -> (i32, i32) {
    %c0_i32 = arith.constant 0 : i32
    %c0_i32_0 = arith.constant 0 : i32
    %c0_i32_1 = arith.constant 0 : i32
    return %c0_i32, %c0_i32_0 : i32, i32
  }
  func.func @transform_5(%arg0: i32) -> (i32, i32) {
    %c0_i32 = arith.constant 0 : i32
    %c0_i32_0 = arith.constant 0 : i32
    return %arg0, %c0_i32 : i32, i32
  }
}

</mosaic_0001>

<bundles_post_ra>
// kernel: control_nn_forward.1
= control target key start
LH: loop header
LB: loop body
LE: loop exit
PB: predicated region body
PF: predicated region fallthrough
CT: control target
= control target key end

     0   :  { %v99_v0 = vmov 0   ;;  %v100_v2 = vmov 1   ;;  %vm63_vm0 = vcmask 261120   ;;  %vm75_vm1 = vcmask 7168   ;;  %s156_s0 = inlined_call_operand.vmem [shape: f32[8,2], index: 0, kind: input, shape index: {}]   ;;  %s157_s4 = inlined_call_operand.<no memory space> [shape: f32[1,1], index: 4, kind: input, shape index: {}]   ;;  %s158_s1 = inlined_call_operand.vmem [shape: f32[2,33], index: 1, kind: input, shape index: {}]   ;;  %s159_s2 = inlined_call_operand.vmem [shape: f32[1,33], index: 2, kind: input, shape index: {}]   ;;  %s160_s3 = inlined_call_operand.vmem [shape: f32[1,32], index: 3, kind: input, shape index: {}]   ;;  %s161_s5 = inlined_call_operand.vmem [shape: f32[8,2], index: 5, kind: output, shape index: {}]  }
   0x1   :  { %95 = vset.pattern.permute.xlu0 %v99_v0  ;;  %v22_v1 = vld [vmem:[%s156_s0] sm:$0xff]  ;;  %v10_v3 = vstv %s157_s4  ;;  %vm81_vm2 = vcmask 15368  }
   0x2   :  { %27 = vperm.xlu0 %95, %v22_v1   ;;  %11 = vst [vmem:[#allocation2] sm:$0x1] %v10_v3  ;;  %v87_v4 = vld [vmem:[%s158_s1] ss:$0 sm:$0xff]  ;;  %v89_v8 = vld [vmem:[%s158_s1 + $0x1] ss:$0 sm:$0xff] }
   0x3   :  { %v88_v7 = vld [vmem:[%s159_s2] ss:$0 sm:$0xff]  ;;  %s101_s2 = smov 97  }
   0x4   :  { %v90_v13 = vld [vmem:[%s160_s3] ss:$0 sm:$0xff] }
   0x6   :  { %96 = vset.pattern.permute.xlu0 %v100_v2 }
   0x7   :  { %44 = vperm.xlu0 %96, %v22_v1  }
   0x9   :  { %v91_v18 = vld [vmem:[#allocation2] ss:$0 sm:$0xff] }
  0x81   :  { %v28_v5 = vpop.permute.xlu0 %27 }
  0x82   :  { %v34_v6 = vmul.f32 %v87_v4, %v28_v5 }
  0x84   :  { %v41_v10 = vadd.f32 %v88_v7, %v34_v6 }
  0x86   :  { %v45_v9 = vpop.permute.xlu0 %44 }
  0x87   :  { %v51_v11 = vmul.f32 %v89_v8, %v45_v9 }
  0x89   :  { %v52_v12 = vadd.f32 %v51_v11, %v41_v10 }
  0x8b   :  { %97 = vtanh.f32 %v52_v12  ;;  %v54_v17 = vmax.f32 %v52_v12, 0.0 }
  0x95   :  { %v98_v14 = vpop.eup %97 }
  0x96   :  { %v62_v15 = vmul.f32 %v98_v14, %v90_v13 }
  0x98   :  { %v64_v16 = vsel %vm63_vm0, %v62_v15, 0.0 }
  0x99   :  { %65 = vadd.xlane.f32.xlu1 %v64_v16 }
  0xaa   :  { %78 = vrot.lane.b32.xlu1 %v54_v17, %s101_s2 }
 0x126   :  { %v66_v19 = vpop.xlane.xlu1 %65 }
 0x127   :  { %v74_v20 = vadd.f32 %v91_v18, %v66_v19 }
 0x129   :  { %76 = vst.msk [vmem:[%s161_s5] sm:$0xff] %vm75_vm1, %v74_v20 }
 0x12a   :  { %v79_v21 = vpop.permute.xlu1 %78 }
 0x12b   :  { %82 = vst.msk [vmem:[%s161_s5] sm:$0xff] %vm81_vm2, %v79_v21 }

</bundles_post_ra>
